<compile_context>
chip_gen: v7x
topology: tpu7x:2x2x1
jax: 0.10.0
libtpu: 0.0.40
codegen_flags: <defaults>
</compile_context>

<pallas_src>
import functools
from typing import Dict, List, Sequence

import jax
import jax.numpy as jnp
from jax.experimental import pallas as pl
from jax.experimental.pallas import tpu as pltpu


_TM_DEFAULT = 4096  # batch-tile width (lanes); per-tile VMEM footprint ~1.5 MiB


# ---------------------------------------------------------------------------
# Fast sin: one fold into [-pi, pi] (Cody-Waite) + odd polynomial through x^15.
# ---------------------------------------------------------------------------
_INV_TWO_PI = 0.15915494309189535
_TWO_PI_HI = 6.2831854820251465        # float32(2*pi)
_TWO_PI_LO = -1.7484556000744819e-07   # 2*pi - float32(2*pi)
_SIN_COEFFS = (
    -0.16666666666666666,    # -1/3!
    0.008333333333333333,    # +1/5!
    -1.984126984126984e-04,  # -1/7!
    2.7557319223985893e-06,  # +1/9!
    -2.505210838544172e-08,  # -1/11!
    1.6059043836821613e-10,  # +1/13!
    -7.647163731819816e-13,  # -1/15!
)


def _sin_approx(x):
    k = jnp.floor(x * _INV_TWO_PI + 0.5)   # round to nearest integer fold
    r = x - k * _TWO_PI_HI
    r = r - k * _TWO_PI_LO                  # r in [-pi, pi]
    r2 = r * r
    p = _SIN_COEFFS[-1]
    for c in _SIN_COEFFS[-2::-1]:
        p = p * r2 + c
    return r + r * (r2 * p)


# ---------------------------------------------------------------------------
# Pallas kernel (feature-major).  refs = (w0, b0, w1, b1, ..., out_ref).
#   z_ref : (d_in, TM)   wl: (fan_out_l, fan_in_l)   bl: (fan_out_l, 1)
#   out   : (d_out, TM)
# ---------------------------------------------------------------------------
def _fcn_kernel(n_layers, act, z_ref, *refs):
    out_ref = refs[-1]
    d_in = z_ref.shape[0]
    z = z_ref[...]                                      # (d_in, TM)

    # Layer 0 on the VPU: fan-in is tiny (2..4), so a rank-d_in outer product
    # is cheaper than pushing a K=d_in matmul through the MXU; bias fused in.
    w0 = refs[0][...]                                   # (H0, d_in)
    b0 = refs[1][...]                                   # (H0, 1)
    h = w0[:, 0:1] * z[0:1, :] + b0                     # (H0, TM)
    for k in range(1, d_in):
        h = h + w0[:, k:k + 1] * z[k:k + 1, :]
    if n_layers > 1:
        h = act(h)

    # Remaining layers on the MXU.
    for l in range(1, n_layers):
        w = refs[2 * l][...]
        b = refs[2 * l + 1][...]
        h = jnp.dot(w, h, preferred_element_type=jnp.float32) + b
        if l < n_layers - 1:
            h = act(h)

    out_ref[...] = h.astype(out_ref.dtype)              # (d_out, TM)


def _round_up(x: int, m: int) -> int:
    return (x + m - 1) // m * m


@functools.partial(jax.jit, static_argnames=("act_function",))
def _fcn_pallas(z_fm, params, act_function="sin"):
    """z_fm: (d_in, N) feature-major f32.  params: ((W, b), ...) with W
    (fan_out, fan_in) and b (fan_out, 1).  Returns (d_out, N) feature-major."""
    d_in, n = z_fm.shape
    n_layers = len(params)
    d_out = params[-1][0].shape[0]

    # Pad the batch only to a multiple of 128 (lane width).
    n_pad = _round_up(max(n, 1), 128)
    if n_pad != n:
        z_fm = jnp.pad(z_fm, ((0, 0), (0, n_pad - n)))

    # >=2 grid steps whenever the padded batch allows it (v7x megacore);
    # tm stays a multiple of 128 and <= n_pad.
    tm = min(_TM_DEFAULT, _round_up(pl.cdiv(n_pad, 2), 128), n_pad)
    grid = (pl.cdiv(n_pad, tm),)

    act = _sin_approx if act_function == "sin" else jnp.tanh

    in_specs = [pl.BlockSpec((d_in, tm), lambda i: (0, i))]   # pipelined z tile
    args = [z_fm]
    for w, b in params:
        in_specs.append(pl.BlockSpec(w.shape, lambda i: (0, 0)))  # resident
        in_specs.append(pl.BlockSpec(b.shape, lambda i: (0, 0)))  # resident
        args.extend((w, b))

    n_work = grid[0] * tm
    w_elems = sum(int(w.size) for w, _ in params)
    hid_total = sum(int(w.shape[0]) for w, _ in params[:-1])
    flops = 2 * n_work * w_elems + 20 * n_work * hid_total
    bytes_acc = 4 * (n_work * (d_in + d_out)
                     + sum(int(w.size) + int(b.size) for w, b in params))

    out = pl.pallas_call(
        functools.partial(_fcn_kernel, n_layers, act),
        out_shape=jax.ShapeDtypeStruct((d_out, n_pad), jnp.float32),
        grid_spec=pltpu.PrefetchScalarGridSpec(
            num_scalar_prefetch=0,
            grid=grid,
            in_specs=in_specs,
            out_specs=pl.BlockSpec((d_out, tm), lambda i: (0, i)),
        ),
        compiler_params=pltpu.CompilerParams(
            dimension_semantics=("parallel",)),
        cost_estimate=pl.CostEstimate(
            flops=int(flops), transcendentals=0, bytes_accessed=int(bytes_acc)),
    )(*args)

    return out[:, :n] if n_pad != n else out


# ---------------------------------------------------------------------------
# Parameter init (PyTorch nn.Linear layout: W is (fan_out, fan_in)).
# Weights: xavier_uniform; biases: uniform(-1/sqrt(fan_in), 1/sqrt(fan_in)).
# Biases are stored as (fan_out, 1) for the feature-major kernel.
# ---------------------------------------------------------------------------
def init_fcn_params(layers: List[int], key):
    params = []
    for i in range(len(layers) - 1):
        fan_in, fan_out = layers[i], layers[i + 1]
        key, kw, kb = jax.random.split(key, 3)
        limit = (6.0 / (fan_in + fan_out)) ** 0.5
        w = jax.random.uniform(kw, (fan_out, fan_in), jnp.float32, -limit, limit)
        blim = 1.0 / (fan_in ** 0.5)
        b = jax.random.uniform(kb, (fan_out, 1), jnp.float32, -blim, blim)
        params.append((w, b))
    return params


def _feature_major(arrays: Sequence[jnp.ndarray]) -> jnp.ndarray:
    """Stack a list of (N,1)/(N,)/(N,d) inputs into a (d_in, N) array without
    an HBM transpose for the common (N,1) column case (reshape is free)."""
    rows = []
    for a in arrays:
        a = jnp.asarray(a, jnp.float32)
        if a.ndim == 1 or (a.ndim == 2 and a.shape[1] == 1):
            rows.append(a.reshape(1, -1))
        else:
            rows.append(a.T)
    return jnp.concatenate(rows, axis=0)


# ---------------------------------------------------------------------------
# FCN forward wrapper (continuous + discrete paths, matching PyTorch FCN).
# ---------------------------------------------------------------------------
def fcn_forward(spatial: List[jnp.ndarray], time, params, lb, ub,
                output_names: List[str], discrete: bool = False,
                act_function: str = "sin") -> Dict[str, jnp.ndarray]:
    if discrete:
        feats = list(spatial) if len(spatial) >= 2 else [spatial[0]]
        lb_use, ub_use = lb[:-1], ub[:-1]
    else:
        feats = list(spatial) + [time]
        lb_use, ub_use = lb, ub

    z_fm = _feature_major(feats)                       # (d_in, N)
    lb_use = jnp.asarray(lb_use, jnp.float32)
    ub_use = jnp.asarray(ub_use, jnp.float32)

    # Fold normalization z_n = z*s + t (s = 2/(ub-lb), t = -2*lb/(ub-lb) - 1)
    # into the first layer:  W0 @ (z*s + t) + b0 = (W0*s) @ z + (b0 + W0 @ t).
    (w0, b0) = params[0]
    s = 2.0 / (ub_use - lb_use)                        # (d_in,)
    t = -2.0 * lb_use / (ub_use - lb_use) - 1.0        # (d_in,)
    w0f = w0 * s[None, :]
    b0f = b0 + (w0 @ t).reshape(-1, 1)
    params_f = ((w0f, b0f),) + tuple((w, b) for w, b in params[1:])

    out_fm = _fcn_pallas(z_fm, params_f, act_function=act_function)  # (d_out, N)

    if discrete:
        full = out_fm.T                                # (N, d_out)
        return {name: full for name in output_names}
    return {name: out_fm[i].reshape(-1, 1) for i, name in enumerate(output_names)}


# ---------------------------------------------------------------------------
# Demo / self-test
# ---------------------------------------------------------------------------
if __name__ == "__main__":
    key = jax.random.PRNGKey(0)

    def reference(z, params):
        h = z
        for i, (w, b) in enumerate(params):
            h = h @ w.T + b.T
            if i < len(params) - 1:
                h = jnp.sin(h)
        return h

    # ---- Test 1: continuous, layers [2,32,32,2], batch 8 -------------------
    layers = [2, 32, 32, 2]
    lb = jnp.array([-1.0, 0.0], jnp.float32)
    ub = jnp.array([1.0, 1.0], jnp.float32)
    key, kp, kx, kt = jax.random.split(key, 4)
    params = init_fcn_params(layers, kp)
    batch = 8
    x = jax.random.uniform(kx, (batch, 1), jnp.float32, -1.0, 1.0)
    t = jax.random.uniform(kt, (batch, 1), jnp.float32, 0.0, 1.0)
    outs = fcn_forward([x], t, params, lb, ub, ["u", "v"])
    jax.block_until_ready(outs)
    z = jnp.concatenate([x, t], axis=1)
    z = 2.0 * (z - lb) / (ub - lb) - 1.0
    ref = reference(z, params)
    for i, name in enumerate(["u", "v"]):
        assert jnp.allclose(outs[name], ref[:, i:i + 1], atol=5e-5), name

    # ---- Test 2: continuous, deeper net, ragged batch (partial last block) -
    layers = [3, 32, 32, 32, 1]
    lb = jnp.array([-1.0, -1.0, 0.0], jnp.float32)
    ub = jnp.array([1.0, 1.0, 2.0], jnp.float32)
    key, kp, kx, ky, kt = jax.random.split(key, 5)
    params = init_fcn_params(layers, kp)
    batch = 300
    x = jax.random.uniform(kx, (batch, 1), jnp.float32, -1.0, 1.0)
    y = jax.random.uniform(ky, (batch, 1), jnp.float32, -1.0, 1.0)
    t = jax.random.uniform(kt, (batch, 1), jnp.float32, 0.0, 2.0)
    outs = fcn_forward([x, y], t, params, lb, ub, ["p"])
    jax.block_until_ready(outs)
    z = jnp.concatenate([x, y, t], axis=1)
    z = 2.0 * (z - lb) / (ub - lb) - 1.0
    ref = reference(z, params)
    assert jnp.allclose(outs["p"], ref[:, 0:1], atol=5e-5), "p"

    # ---- Test 3: discrete path (2 spatial inputs, lb/ub drop time bound) ---
    layers = [2, 32, 4]
    lb = jnp.array([0.0, 0.0, 0.0], jnp.float32)
    ub = jnp.array([1.0, 2.0, 1.0], jnp.float32)
    key, kp, kx, ky = jax.random.split(key, 4)
    params = init_fcn_params(layers, kp)
    batch = 16
    x = jax.random.uniform(kx, (batch, 1), jnp.float32, 0.0, 1.0)
    y = jax.random.uniform(ky, (batch, 1), jnp.float32, 0.0, 2.0)
    outs = fcn_forward([x, y], None, params, lb, ub, ["u0", "u1"], discrete=True)
    jax.block_until_ready(outs)
    z = jnp.concatenate([x, y], axis=1)
    z = 2.0 * (z - lb[:-1]) / (ub[:-1] - lb[:-1]) - 1.0
    ref = reference(z, params)
    assert jnp.allclose(outs["u0"], ref, atol=5e-5), "u0"
    assert jnp.allclose(outs["u1"], ref, atol=5e-5), "u1"

    print("KERNEL_OK")
</pallas_src>

<mosaic_0001>
module attributes {stable_mosaic.version = 11 : i64} {
  func.func @_fcn_kernel(%arg0: i32, %arg1: memref<2x128xf32, #tpu.memory_space<vmem>>, %arg2: memref<32x2xf32, #tpu.memory_space<vmem>>, %arg3: memref<32x1xf32, #tpu.memory_space<vmem>>, %arg4: memref<32x32xf32, #tpu.memory_space<vmem>>, %arg5: memref<32x1xf32, #tpu.memory_space<vmem>>, %arg6: memref<2x32xf32, #tpu.memory_space<vmem>>, %arg7: memref<2x1xf32, #tpu.memory_space<vmem>>, %arg8: memref<2x128xf32, #tpu.memory_space<vmem>>) attributes {dimension_semantics = [#tpu.dimension_semantics<parallel>], iteration_bounds = array<i64: 1>, scalar_prefetch = 0 : i64, scratch_operands = 0 : i64, tpu.core_type = #tpu.core_type<tc>, window_params = [{transform_indices = @transform_0, window_bounds = array<i64: 2, 128>}, {pipeline_mode = #tpu.pipeline_mode<synchronous>, transform_indices = @transform_1, window_bounds = array<i64: 32, 2>}, {pipeline_mode = #tpu.pipeline_mode<synchronous>, transform_indices = @transform_2, window_bounds = array<i64: 32, 1>}, {pipeline_mode = #tpu.pipeline_mode<synchronous>, transform_indices = @transform_3, window_bounds = array<i64: 32, 32>}, {pipeline_mode = #tpu.pipeline_mode<synchronous>, transform_indices = @transform_4, window_bounds = array<i64: 32, 1>}, {pipeline_mode = #tpu.pipeline_mode<synchronous>, transform_indices = @transform_5, window_bounds = array<i64: 2, 32>}, {pipeline_mode = #tpu.pipeline_mode<synchronous>, transform_indices = @transform_6, window_bounds = array<i64: 2, 1>}, {transform_indices = @transform_7, window_bounds = array<i64: 2, 128>}]} {
    %c0 = arith.constant 0 : index
    %c0_0 = arith.constant 0 : index
    %0 = vector.load %arg1[%c0, %c0_0] : memref<2x128xf32, #tpu.memory_space<vmem>>, vector<2x128xf32>
    %c0_1 = arith.constant 0 : index
    %c0_2 = arith.constant 0 : index
    %1 = vector.load %arg2[%c0_1, %c0_2] : memref<32x2xf32, #tpu.memory_space<vmem>>, vector<32x2xf32>
    %c0_3 = arith.constant 0 : index
    %c0_4 = arith.constant 0 : index
    %2 = vector.load %arg3[%c0_3, %c0_4] : memref<32x1xf32, #tpu.memory_space<vmem>>, vector<32x1xf32>
    %3 = vector.extract_strided_slice %1 {offsets = [0, 0], sizes = [32, 1], strides = [1, 1]} : vector<32x2xf32> to vector<32x1xf32>
    %4 = vector.extract_strided_slice %0 {offsets = [0, 0], sizes = [1, 128], strides = [1, 1]} : vector<2x128xf32> to vector<1x128xf32>
    %5 = vector.broadcast %3 : vector<32x1xf32> to vector<32x128xf32>
    %6 = vector.broadcast %4 : vector<1x128xf32> to vector<32x128xf32>
    %7 = arith.mulf %5, %6 : vector<32x128xf32>
    %8 = vector.broadcast %2 : vector<32x1xf32> to vector<32x128xf32>
    %9 = arith.addf %7, %8 : vector<32x128xf32>
    %10 = vector.extract_strided_slice %1 {offsets = [0, 1], sizes = [32, 1], strides = [1, 1]} : vector<32x2xf32> to vector<32x1xf32>
    %11 = vector.extract_strided_slice %0 {offsets = [1, 0], sizes = [1, 128], strides = [1, 1]} : vector<2x128xf32> to vector<1x128xf32>
    %12 = vector.broadcast %10 : vector<32x1xf32> to vector<32x128xf32>
    %13 = vector.broadcast %11 : vector<1x128xf32> to vector<32x128xf32>
    %14 = arith.mulf %12, %13 : vector<32x128xf32>
    %15 = arith.addf %9, %14 : vector<32x128xf32>
    %cst = arith.constant 0.159154937 : f32
    %16 = vector.broadcast %cst : f32 to vector<32x128xf32>
    %17 = arith.mulf %15, %16 : vector<32x128xf32>
    %cst_5 = arith.constant 5.000000e-01 : f32
    %18 = vector.broadcast %cst_5 : f32 to vector<32x128xf32>
    %19 = arith.addf %17, %18 : vector<32x128xf32>
    %20 = math.floor %19 : vector<32x128xf32>
    %cst_6 = arith.constant 6.28318548 : f32
    %21 = vector.broadcast %cst_6 : f32 to vector<32x128xf32>
    %22 = arith.mulf %20, %21 : vector<32x128xf32>
    %23 = arith.subf %15, %22 : vector<32x128xf32>
    %cst_7 = arith.constant -1.74845553E-7 : f32
    %24 = vector.broadcast %cst_7 : f32 to vector<32x128xf32>
    %25 = arith.mulf %20, %24 : vector<32x128xf32>
    %26 = arith.subf %23, %25 : vector<32x128xf32>
    %27 = arith.mulf %26, %26 : vector<32x128xf32>
    %cst_8 = arith.constant -7.6471636E-13 : f32
    %28 = vector.broadcast %cst_8 : f32 to vector<32x128xf32>
    %29 = arith.mulf %28, %27 : vector<32x128xf32>
    %cst_9 = arith.constant 1.60590444E-10 : f32
    %30 = vector.broadcast %cst_9 : f32 to vector<32x128xf32>
    %31 = arith.addf %29, %30 : vector<32x128xf32>
    %32 = arith.mulf %31, %27 : vector<32x128xf32>
    %cst_10 = arith.constant -2.50521079E-8 : f32
    %33 = vector.broadcast %cst_10 : f32 to vector<32x128xf32>
    %34 = arith.addf %32, %33 : vector<32x128xf32>
    %35 = arith.mulf %34, %27 : vector<32x128xf32>
    %cst_11 = arith.constant 2.75573188E-6 : f32
    %36 = vector.broadcast %cst_11 : f32 to vector<32x128xf32>
    %37 = arith.addf %35, %36 : vector<32x128xf32>
    %38 = arith.mulf %37, %27 : vector<32x128xf32>
    %cst_12 = arith.constant -1.98412701E-4 : f32
    %39 = vector.broadcast %cst_12 : f32 to vector<32x128xf32>
    %40 = arith.addf %38, %39 : vector<32x128xf32>
    %41 = arith.mulf %40, %27 : vector<32x128xf32>
    %cst_13 = arith.constant 0.00833333377 : f32
    %42 = vector.broadcast %cst_13 : f32 to vector<32x128xf32>
    %43 = arith.addf %41, %42 : vector<32x128xf32>
    %44 = arith.mulf %43, %27 : vector<32x128xf32>
    %cst_14 = arith.constant -0.166666672 : f32
    %45 = vector.broadcast %cst_14 : f32 to vector<32x128xf32>
    %46 = arith.addf %44, %45 : vector<32x128xf32>
    %47 = arith.mulf %27, %46 : vector<32x128xf32>
    %48 = arith.mulf %26, %47 : vector<32x128xf32>
    %49 = arith.addf %26, %48 : vector<32x128xf32>
    %c0_15 = arith.constant 0 : index
    %c0_16 = arith.constant 0 : index
    %50 = vector.load %arg4[%c0_15, %c0_16] : memref<32x32xf32, #tpu.memory_space<vmem>>, vector<32x32xf32>
    %c0_17 = arith.constant 0 : index
    %c0_18 = arith.constant 0 : index
    %51 = vector.load %arg5[%c0_17, %c0_18] : memref<32x1xf32, #tpu.memory_space<vmem>>, vector<32x1xf32>
    %cst_19 = arith.constant dense<0.000000e+00> : vector<32x128xf32>
    %52 = tpu.matmul %50, %49, %cst_19 {dimension_numbers = #tpu.dot_dimension_numbers<[1], [0], [0], [1], [0, 0, 1, 1], [], []>} : vector<32x32xf32>, vector<32x128xf32>, vector<32x128xf32> -> vector<32x128xf32>
    %53 = vector.broadcast %51 : vector<32x1xf32> to vector<32x128xf32>
    %54 = arith.addf %52, %53 : vector<32x128xf32>
    %cst_20 = arith.constant 0.159154937 : f32
    %55 = vector.broadcast %cst_20 : f32 to vector<32x128xf32>
    %56 = arith.mulf %54, %55 : vector<32x128xf32>
    %cst_21 = arith.constant 5.000000e-01 : f32
    %57 = vector.broadcast %cst_21 : f32 to vector<32x128xf32>
    %58 = arith.addf %56, %57 : vector<32x128xf32>
    %59 = math.floor %58 : vector<32x128xf32>
    %cst_22 = arith.constant 6.28318548 : f32
    %60 = vector.broadcast %cst_22 : f32 to vector<32x128xf32>
    %61 = arith.mulf %59, %60 : vector<32x128xf32>
    %62 = arith.subf %54, %61 : vector<32x128xf32>
    %cst_23 = arith.constant -1.74845553E-7 : f32
    %63 = vector.broadcast %cst_23 : f32 to vector<32x128xf32>
    %64 = arith.mulf %59, %63 : vector<32x128xf32>
    %65 = arith.subf %62, %64 : vector<32x128xf32>
    %66 = arith.mulf %65, %65 : vector<32x128xf32>
    %cst_24 = arith.constant -7.6471636E-13 : f32
    %67 = vector.broadcast %cst_24 : f32 to vector<32x128xf32>
    %68 = arith.mulf %67, %66 : vector<32x128xf32>
    %cst_25 = arith.constant 1.60590444E-10 : f32
    %69 = vector.broadcast %cst_25 : f32 to vector<32x128xf32>
    %70 = arith.addf %68, %69 : vector<32x128xf32>
    %71 = arith.mulf %70, %66 : vector<32x128xf32>
    %cst_26 = arith.constant -2.50521079E-8 : f32
    %72 = vector.broadcast %cst_26 : f32 to vector<32x128xf32>
    %73 = arith.addf %71, %72 : vector<32x128xf32>
    %74 = arith.mulf %73, %66 : vector<32x128xf32>
    %cst_27 = arith.constant 2.75573188E-6 : f32
    %75 = vector.broadcast %cst_27 : f32 to vector<32x128xf32>
    %76 = arith.addf %74, %75 : vector<32x128xf32>
    %77 = arith.mulf %76, %66 : vector<32x128xf32>
    %cst_28 = arith.constant -1.98412701E-4 : f32
    %78 = vector.broadcast %cst_28 : f32 to vector<32x128xf32>
    %79 = arith.addf %77, %78 : vector<32x128xf32>
    %80 = arith.mulf %79, %66 : vector<32x128xf32>
    %cst_29 = arith.constant 0.00833333377 : f32
    %81 = vector.broadcast %cst_29 : f32 to vector<32x128xf32>
    %82 = arith.addf %80, %81 : vector<32x128xf32>
    %83 = arith.mulf %82, %66 : vector<32x128xf32>
    %cst_30 = arith.constant -0.166666672 : f32
    %84 = vector.broadcast %cst_30 : f32 to vector<32x128xf32>
    %85 = arith.addf %83, %84 : vector<32x128xf32>
    %86 = arith.mulf %66, %85 : vector<32x128xf32>
    %87 = arith.mulf %65, %86 : vector<32x128xf32>
    %88 = arith.addf %65, %87 : vector<32x128xf32>
    %c0_31 = arith.constant 0 : index
    %c0_32 = arith.constant 0 : index
    %89 = vector.load %arg6[%c0_31, %c0_32] : memref<2x32xf32, #tpu.memory_space<vmem>>, vector<2x32xf32>
    %c0_33 = arith.constant 0 : index
    %c0_34 = arith.constant 0 : index
    %90 = vector.load %arg7[%c0_33, %c0_34] : memref<2x1xf32, #tpu.memory_space<vmem>>, vector<2x1xf32>
    %cst_35 = arith.constant dense<0.000000e+00> : vector<2x128xf32>
    %91 = tpu.matmul %89, %88, %cst_35 {dimension_numbers = #tpu.dot_dimension_numbers<[1], [0], [0], [1], [0, 0, 1, 1], [], []>} : vector<2x32xf32>, vector<32x128xf32>, vector<2x128xf32> -> vector<2x128xf32>
    %92 = vector.broadcast %90 : vector<2x1xf32> to vector<2x128xf32>
    %93 = arith.addf %91, %92 : vector<2x128xf32>
    %c0_36 = arith.constant 0 : index
    %c0_37 = arith.constant 0 : index
    %94 = vector.load %arg8[%c0_36, %c0_37] : memref<2x128xf32, #tpu.memory_space<vmem>>, vector<2x128xf32>
    tpu.vector_store %arg8[%c0_36, %c0_37], %93 {strides = array<i32>} : memref<2x128xf32, #tpu.memory_space<vmem>>, vector<2x128xf32>,
    return
  }
  func.func @transform_0(%arg0: i32) -> (i32, i32) {
    %c0_i32 = arith.constant 0 : i32
    %c0_i32_0 = arith.constant 0 : i32
    return %c0_i32, %arg0 : i32, i32
  }
  func.func @transform_1(%arg0: i32) -> (i32, i32) {
    %c0_i32 = arith.constant 0 : i32
    %c0_i32_0 = arith.constant 0 : i32
    %c0_i32_1 = arith.constant 0 : i32
    return %c0_i32, %c0_i32_0 : i32, i32
  }
  func.func @transform_2(%arg0: i32) -> (i32, i32) {
    %c0_i32 = arith.constant 0 : i32
    %c0_i32_0 = arith.constant 0 : i32
    %c0_i32_1 = arith.constant 0 : i32
    return %c0_i32, %c0_i32_0 : i32, i32
  }
  func.func @transform_3(%arg0: i32) -> (i32, i32) {
    %c0_i32 = arith.constant 0 : i32
    %c0_i32_0 = arith.constant 0 : i32
    %c0_i32_1 = arith.constant 0 : i32
    return %c0_i32, %c0_i32_0 : i32, i32
  }
  func.func @transform_4(%arg0: i32) -> (i32, i32) {
    %c0_i32 = arith.constant 0 : i32
    %c0_i32_0 = arith.constant 0 : i32
    %c0_i32_1 = arith.constant 0 : i32
    return %c0_i32, %c0_i32_0 : i32, i32
  }
  func.func @transform_5(%arg0: i32) -> (i32, i32) {
    %c0_i32 = arith.constant 0 : i32
    %c0_i32_0 = arith.constant 0 : i32
    %c0_i32_1 = arith.constant 0 : i32
    return %c0_i32, %c0_i32_0 : i32, i32
  }
  func.func @transform_6(%arg0: i32) -> (i32, i32) {
    %c0_i32 = arith.constant 0 : i32
    %c0_i32_0 = arith.constant 0 : i32
    %c0_i32_1 = arith.constant 0 : i32
    return %c0_i32, %c0_i32_0 : i32, i32
  }
  func.func @transform_7(%arg0: i32) -> (i32, i32) {
    %c0_i32 = arith.constant 0 : i32
    %c0_i32_0 = arith.constant 0 : i32
    return %c0_i32, %arg0 : i32, i32
  }
}

</mosaic_0001>

<bundles_post_ra>
// kernel: _fcn_pallas.1
= control target key start
LH: loop header
LB: loop body
LE: loop exit
PB: predicated region body
PF: predicated region fallthrough
CT: control target
= control target key end

     0   :  { %v616_v2 = vmov 0   ;;  %s780_s0 = inlined_call_operand.vmem [shape: f32[2,128], index: 0, kind: input, shape index: {}]   ;;  %s781_s1 = inlined_call_operand.vmem [shape: f32[32,2], index: 1, kind: input, shape index: {}]   ;;  %s782_s2 = inlined_call_operand.vmem [shape: f32[32,1], index: 2, kind: input, shape index: {}]   ;;  %s783_s3 = inlined_call_operand.vmem [shape: f32[32,32], index: 3, kind: input, shape index: {}]   ;;  %s784_s4 = inlined_call_operand.vmem [shape: f32[32,1], index: 4, kind: input, shape index: {}]   ;;  %s785_s5 = inlined_call_operand.vmem [shape: f32[2,32], index: 5, kind: input, shape index: {}]   ;;  %s786_s6 = inlined_call_operand.vmem [shape: f32[2,1], index: 6, kind: input, shape index: {}]   ;;  %s787_s7 = inlined_call_operand.hbm [shape: f32[2,128], index: 7, kind: output, shape index: {}]  }
   0x1   :  { %v32_v0 = vld [vmem:[%s782_s2] sm:$0xff]  ;;  %585 = vset.pattern.permute.xlu1 %v616_v2  ;;  %584 = vset.pattern.permute.xlu0 %v616_v2  ;;  %v33_v3 = vld [vmem:[%s782_s2 + $0x8] sm:$0xff] }
   0x2   :  { %v28_v1 = vld [vmem:[%s781_s1] sm:$0xff]  ;;  %66 = vperm.xlu1 %585, %v32_v0   ;;  %v29_v4 = vld [vmem:[%s781_s1 + $0x8] sm:$0xff] }
   0x3   :  { %38 = vperm.xlu0 %584, %v28_v1  }
   0x4   :  { %12 = vsyncpa [#allocation3], 0  ;;  %v31_v5 = vld [vmem:[%s781_s1 + $0x18] sm:$0xff]  ;;  %v617_v6 = vmov 1   ;;  %v30_v7 = vld [vmem:[%s781_s1 + $0x10] sm:$0xff]  ;;  %vm236_vm0 = vcmask 261120   ;;  %v56_v16 = vlaneseq }
   0x5   :  { %v34_v8 = vld [vmem:[%s782_s2 + $0x10] sm:$0xff]  ;;  %v35_v9 = vld [vmem:[%s782_s2 + $0x18] sm:$0xff]  ;;  %v208_v10 = vld [vmem:[%s783_s3] sm:$0xff]  ;;  %vm619_vm1 = vmmov 0   ;;  %s621_s10 = smov [#allocation2]  }
   0x6   :  { %71 = vperm.xlu1 %585, %v33_v3   ;;  %547 = vmatprep.mubr.msk.f32.mxu0 %vm236_vm0, %v208_v10  ;;  %v212_v11 = vld [vmem:[%s784_s4] sm:$0xff]  ;;  %v213_v12 = vld [vmem:[%s784_s4 + $0x8] sm:$0xff]  ;;  %v214_v13 = vld [vmem:[%s784_s4 + $0x10] sm:$0xff]  ;;  %v57_v17 = vshrl.u32 %v56_v16, 7  ;;  %s513_s11 = sshll.u32 %s621_s10, 4  ;;  %s514_s11 = int_to_ptr.vmem [resolvable:$true] %s513_s11 }
   0x7   :  { %43 = vperm.xlu0 %584, %v29_v4   ;;  %v427_v14 = vld [vmem:[%s786_s6] sm:$0x3]  ;;  %v215_v15 = vld [vmem:[%s784_s4 + $0x18] sm:$0xff]  ;;  %s592_s12 = scalar_lea.vmem %s514_s11, 32  ;;  %p597_p1 = scmp.lt.s32.totalorder %s514_s11, %s514_s11 }
   0x8   :  { %v58_v19 = vsub.s32 0, %v57_v17  ;;  %v27_v21 = vld [vmem:[%s780_s0] sm:$0x3]  ;;  %v106_v22 = vsub.s32 1, %v57_v17  ;;  %p593_p0 = scmp.ne.s32.totalorder %s514_s11, %s592_s12  ;;  %p598_p2 = scmp.lt.s32.totalorder %s592_s12, %s592_s12 }
   0xa   :  { %586 = vset.pattern.permute.xlu1 %v617_v6  ;;  %v59_v23 = vrot.slane %v27_v21, %v58_v19  ;;  %v107_v27 = vrot.slane %v27_v21, %v106_v22  ;;  %p599_p3 = por %p598_p2, %p597_p1 }
   0xb   :  { %53 = vperm.xlu0 %584, %v31_v5   ;;  %93 = vperm.xlu1 %586, %v29_v4  }
   0xc   :  { %p600_p4 = pnand %p599_p3, %p593_p0 }
   0xf   :  { %588 = vset.pattern.permute.xlu0 %v617_v6  ;;  %587 = vset.pattern.permute.xlu1 %v616_v2 }
  0x10   :  { %89 = vperm.xlu0 %588, %v28_v1   ;;  %48 = vperm.xlu1 %587, %v30_v7  }
  0x14   :  { %97 = vperm.xlu0 %588, %v30_v7   ;;  %76 = vperm.xlu1 %587, %v34_v8  }
  0x18   :  { %591 = vset.pattern.permute.xlu0 %v616_v2  ;;  %81 = vperm.xlu1 %587, %v35_v9  }
  0x19   :  { %223 = vperm.xlu0 %591, %v213_v12  }
  0x1c   :  { %589 = vset.pattern.permute.xlu1 %v617_v6 }
  0x1d   :  { %101 = vperm.xlu1 %589, %v31_v5   ;;  %430 = vperm.xlu0 %591, %v427_v14  }
  0x21   :  { %590 = vset.pattern.permute.xlu1 %v616_v2 }
  0x22   :  { %218 = vperm.xlu1 %590, %v212_v11  }
  0x26   :  { %228 = vperm.xlu1 %590, %v214_v13  }
  0x2a   :  { %233 = vperm.xlu1 %590, %v215_v15  }
  0x81   :  { %v67_v18 = vpop.permute.xlu1 %66 }
  0x82   :  { %v39_v20 = vpop.permute.xlu0 %38 }
  0x83   :  { %v60_v30 = vmul.f32 %v59_v23, %v39_v20 }
  0x85   :  { %v72_v24 = vpop.permute.xlu1 %71  ;;  %v84_v35 = vadd.f32 %v67_v18, %v60_v30 }
  0x86   :  { %v44_v25 = vpop.permute.xlu0 %43 }
  0x87   :  { %v61_v26 = vmul.f32 %v59_v23, %v44_v25 }
  0x89   :  { %v85_v31 = vadd.f32 %v72_v24, %v61_v26 }
  0x8a   :  { %v54_v28 = vpop.permute.xlu0 %53  ;;  %v94_v29 = vpop.permute.xlu1 %93 }
  0x8b   :  { %v109_v32 = vmul.f32 %v107_v27, %v94_v29  ;;  %v63_v60 = vmul.f32 %v59_v23, %v54_v28 }
  0x8d   :  { %v113_v33 = vadd.f32 %v109_v32, %v85_v31 }
  0x8f   :  { %v90_v34 = vpop.permute.xlu0 %89  ;;  %v117_v36 = vmul.f32 0.15915494, %v113_v33  ;;  %v49_v38 = vpop.permute.xlu1 %48 }
  0x90   :  { %v108_v37 = vmul.f32 %v107_v27, %v90_v34  ;;  %v62_v41 = vmul.f32 %v59_v23, %v49_v38 }
  0x91   :  { %v121_v39 = vadd.f32 0.5, %v117_v36 }
  0x92   :  { %v112_v40 = vadd.f32 %v108_v37, %v84_v35 }
  0x93   :  { %v98_v42 = vpop.permute.xlu0 %97  ;;  %v125_v43 = vfloor.f32 %v121_v39  ;;  %v77_v45 = vpop.permute.xlu1 %76 }
  0x94   :  { %v116_v44 = vmul.f32 0.15915494, %v112_v40  ;;  %v110_v46 = vmul.f32 %v107_v27, %v98_v42  ;;  %v86_v47 = vadd.f32 %v77_v45, %v62_v41 }
  0x95   :  { %v129_v48 = vmul.f32 6.2831855, %v125_v43  ;;  %v137_v52 = vmul.f32 -1.7484555e-07, %v125_v43 }
  0x96   :  { %v120_v49 = vadd.f32 0.5, %v116_v44  ;;  %v114_v50 = vadd.f32 %v110_v46, %v86_v47 }
  0x97   :  { %v133_v51 = vsub.f32 %v113_v33, %v129_v48  ;;  %v82_v54 = vpop.permute.xlu1 %81 }
  0x98   :  { %v124_v53 = vfloor.f32 %v120_v49  ;;  %v118_v55 = vmul.f32 0.15915494, %v114_v50  ;;  %v87_v2 = vadd.f32 %v82_v54, %v63_v60 }
  0x99   :  { %v708_v56 = vsub.f32 %v133_v51, %v137_v52 }
  0x9a   :  { %v128_v57 = vmul.f32 6.2831855, %v124_v53  ;;  %v122_v58 = vadd.f32 0.5, %v118_v55  ;;  %v136_v62 = vmul.f32 -1.7484555e-07, %v124_v53 }
  0x9b   :  { %v145_v59 = vmul.f32 %v708_v56, %v708_v56 }
  0x9c   :  { %v132_v61 = vsub.f32 %v112_v40, %v128_v57  ;;  %v126_v63 = vfloor.f32 %v122_v58  ;;  %v102_v0 = vpop.permute.xlu1 %101 }
  0x9d   :  { %v111_v3 = vmul.f32 %v107_v27, %v102_v0  ;;  %v149_v4 = vmul.f32 -7.6471636e-13, %v145_v59 }
  0x9e   :  { %v712_v1 = vsub.f32 %v132_v61, %v136_v62  ;;  %v130_v5 = vmul.f32 6.2831855, %v126_v63  ;;  %v138_v10 = vmul.f32 -1.7484555e-07, %v126_v63 }
  0x9f   :  { %v115_v7 = vadd.f32 %v111_v3, %v87_v2  ;;  %v153_v8 = vadd.f32 1.6059044e-10, %v149_v4 }
  0xa0   :  { %v144_v6 = vmul.f32 %v712_v1, %v712_v1  ;;  %v134_v9 = vsub.f32 %v114_v50, %v130_v5 }
  0xa1   :  { %v119_v11 = vmul.f32 0.15915494, %v115_v7  ;;  %v157_v13 = vmul.f32 %v153_v8, %v145_v59 }
  0xa2   :  { %v148_v12 = vmul.f32 -7.6471636e-13, %v144_v6  ;;  %v716_v14 = vsub.f32 %v134_v9, %v138_v10 }
  0xa3   :  { %v123_v15 = vadd.f32 0.5, %v119_v11  ;;  %v161_v17 = vadd.f32 -2.5052108e-08, %v157_v13 }
  0xa4   :  { %v152_v16 = vadd.f32 1.6059044e-10, %v148_v12  ;;  %v146_v18 = vmul.f32 %v716_v14, %v716_v14 }
  0xa5   :  { %v127_v19 = vfloor.f32 %v123_v15  ;;  %v165_v21 = vmul.f32 %v161_v17, %v145_v59 }
  0xa6   :  { %v156_v20 = vmul.f32 %v152_v16, %v144_v6  ;;  %v150_v22 = vmul.f32 -7.6471636e-13, %v146_v18 }
  0xa7   :  { %v131_v23 = vmul.f32 6.2831855, %v127_v19  ;;  %v169_v25 = vadd.f32 2.7557319e-06, %v165_v21  ;;  %v139_v28 = vmul.f32 -1.7484555e-07, %v127_v19 }
  0xa8   :  { %v160_v24 = vadd.f32 -2.5052108e-08, %v156_v20  ;;  %v154_v26 = vadd.f32 1.6059044e-10, %v150_v22  ;;  %v210_v20 = vld [vmem:[%s783_s3 + $0x10] sm:$0xff]  ;;  %v620_v21 = vmov 0.0   ;;  %v219_v22 = vpop.permute.xlu1 %218 }
  0xa9   :  { %v135_v27 = vsub.f32 %v115_v7, %v131_v23  ;;  %v173_v30 = vmul.f32 %v169_v25, %v145_v59  ;;  %561 = vmatprep.mubr.msk.f32.mxu1 %vm619_vm1, %v620_v21 }
  0xaa   :  { %v164_v29 = vmul.f32 %v160_v24, %v144_v6  ;;  %v158_v31 = vmul.f32 %v154_v26, %v146_v18  ;;  %v224_v24 = vpop.permute.xlu0 %223 }
  0xab   :  { %v143_v32 = vsub.f32 %v135_v27, %v139_v28  ;;  %v177_v34 = vadd.f32 -0.0001984127, %v173_v30 }
  0xac   :  { %v168_v33 = vadd.f32 2.7557319e-06, %v164_v29  ;;  %v162_v35 = vadd.f32 -2.5052108e-08, %v158_v31  ;;  %v229_v23 = vpop.permute.xlu1 %228 }
  0xad   :  { %v147_v36 = vmul.f32 %v143_v32, %v143_v32  ;;  %v181_v38 = vmul.f32 %v177_v34, %v145_v59 }
  0xae   :  { %v172_v37 = vmul.f32 %v168_v33, %v144_v6  ;;  %v166_v39 = vmul.f32 %v162_v35, %v146_v18 }
  0xaf   :  { %v151_v41 = vmul.f32 -7.6471636e-13, %v147_v36  ;;  %v185_v42 = vadd.f32 0.008333334, %v181_v38 }
  0xb0   :  { %v176_v40 = vadd.f32 -0.0001984127, %v172_v37  ;;  %v170_v43 = vadd.f32 2.7557319e-06, %v166_v39  ;;  %v234_v30 = vpop.permute.xlu1 %233 }
  0xb1   :  { %v155_v45 = vadd.f32 1.6059044e-10, %v151_v41  ;;  %v189_v46 = vmul.f32 %v185_v42, %v145_v59 }
  0xb2   :  { %v180_v44 = vmul.f32 %v176_v40, %v144_v6  ;;  %v174_v47 = vmul.f32 %v170_v43, %v146_v18 }
  0xb3   :  { %v159_v49 = vmul.f32 %v155_v45, %v147_v36  ;;  %v193_v50 = vadd.f32 -0.16666667, %v189_v46 }
  0xb4   :  { %v184_v48 = vadd.f32 0.008333334, %v180_v44  ;;  %v178_v51 = vadd.f32 -0.0001984127, %v174_v47 }
  0xb5   :  { %v163_v53 = vadd.f32 -2.5052108e-08, %v159_v49  ;;  %v197_v54 = vmul.f32 %v193_v50, %v145_v59 }
  0xb6   :  { %v188_v52 = vmul.f32 %v184_v48, %v144_v6  ;;  %v182_v55 = vmul.f32 %v178_v51, %v146_v18 }
  0xb7   :  { %v167_v58 = vmul.f32 %v163_v53, %v147_v36  ;;  %v201_v62 = vmul.f32 %v197_v54, %v708_v56 }
  0xb8   :  { %v192_v57 = vadd.f32 -0.16666667, %v188_v52  ;;  %v186_v60 = vadd.f32 0.008333334, %v182_v55 }
  0xb9   :  { %v171_v63 = vadd.f32 2.7557319e-06, %v167_v58  ;;  %v205_v5 = vadd.f32 %v201_v62, %v708_v56  ;;  %v209_v56 = vld [vmem:[%s783_s3 + $0x8] sm:$0xff] }
  0xba   :  { %v196_v61 = vmul.f32 %v192_v57, %v144_v6  ;;  %v190_v3 = vmul.f32 %v186_v60, %v146_v18 }
  0xbb   :  { %v175_v2 = vmul.f32 %v171_v63, %v147_v36 }
  0xbc   :  { %v200_v0 = vmul.f32 %v196_v61, %v712_v1  ;;  %v194_v59 = vadd.f32 -0.16666667, %v190_v3 }
  0xbd   :  { %v179_v7 = vadd.f32 -0.0001984127, %v175_v2 }
  0xbe   :  { %v204_v4 = vadd.f32 %v200_v0, %v712_v1  ;;  %v198_v6 = vmul.f32 %v194_v59, %v146_v18  ;;  %v618_v18 = vmov 0.0|0.0  }
  0xbf   :  { %v183_v9 = vmul.f32 %v179_v7, %v147_v36  ;;  %572 = vmatprep.subr.bf16.mxu1 %v618_v18 }
  0xc0   :  { %v564_v8 = vpack.c.bf16 %v205_v5, %v204_v4  ;;  %v202_v15 = vmul.f32 %v198_v6, %v716_v14 }
  0xc1   :  { %v187_v10 = vadd.f32 0.008333334, %v183_v9 }
  0xc2   :  { %565 = vmatprep.subr.bf16.mxu0 %v564_v8  ;;  %v206_v17 = vadd.f32 %v202_v15, %v716_v14  ;;  %v211_v14 = vld [vmem:[%s783_s3 + $0x18] sm:$0xff] }
  0xc3   :  { %567 = vmatpush3.bf16.msra.mxu0 %v564_v8  ;;  %v191_v11 = vmul.f32 %v187_v10, %v147_v36 }
  0xc5   :  { %v195_v12 = vadd.f32 -0.16666667, %v191_v11 }
  0xc7   :  { %v199_v13 = vmul.f32 %v195_v12, %v147_v36 }
  0xc9   :  { %v203_v16 = vmul.f32 %v199_v13, %v143_v32 }
  0xcb   :  { %v207_v19 = vadd.f32 %v203_v16, %v143_v32 }
  0xcd   :  { %v568_v1 = vpack.c.bf16 %v207_v19, %v206_v17 }
  0xcf   :  { %569 = vmatprep.subr.bf16.mxu0 %v568_v1 }
  0xd0   :  { %571 = vmatpush3.bf16.msra.mxu0 %v568_v1 }
  0xd3   :  { %548 = vmatmul.mubr.msk.f32.vlgmr.msra.gmra.mrb[0].mxu0 %vm236_vm0, %v209_v56 }
  0xd4   :  { %550 = vmatprep.mubr.msk.f32.mxu0 %vm236_vm0, %v210_v20 }
  0xd7   :  { %551 = vmatmul.mubr.msk.f32.gmra.mrb[2].mxu0 %vm236_vm0, %v211_v14 }
 0x1a6   :  { %v549_v25 = vpop.f32.mrb[0].mxu0 }
 0x1a7   :  { %v321_v26 = vadd.f32 %v549_v25, %v224_v24  ;;  %v315_v27 = vpop.f32.mrb[1].mxu0 }
 0x1a8   :  { %v316_v28 = vadd.f32 %v315_v27, %v219_v22 }
 0x1a9   :  { %v335_v29 = vmul.f32 0.15915494, %v321_v26 }
 0x1aa   :  { %v334_v31 = vmul.f32 0.15915494, %v316_v28  ;;  %v552_v32 = vpop.f32.mrb[2].mxu0 }
 0x1ab   :  { %v339_v33 = vadd.f32 0.5, %v335_v29  ;;  %v331_v34 = vadd.f32 %v552_v32, %v234_v30  ;;  %v325_v35 = vpop.f32.mrb[3].mxu0 }
 0x1ac   :  { %v338_v36 = vadd.f32 0.5, %v334_v31  ;;  %v326_v37 = vadd.f32 %v325_v35, %v229_v23 }
 0x1ad   :  { %v343_v38 = vfloor.f32 %v339_v33  ;;  %v337_v39 = vmul.f32 0.15915494, %v331_v34 }
 0x1ae   :  { %v342_v40 = vfloor.f32 %v338_v36  ;;  %v336_v41 = vmul.f32 0.15915494, %v326_v37 }
 0x1af   :  { %v347_v42 = vmul.f32 6.2831855, %v343_v38  ;;  %v341_v43 = vadd.f32 0.5, %v337_v39  ;;  %v355_v47 = vmul.f32 -1.7484555e-07, %v343_v38 }
 0x1b0   :  { %v346_v44 = vmul.f32 6.2831855, %v342_v40  ;;  %v340_v45 = vadd.f32 0.5, %v336_v41  ;;  %v354_v50 = vmul.f32 -1.7484555e-07, %v342_v40 }
 0x1b1   :  { %v351_v46 = vsub.f32 %v321_v26, %v347_v42  ;;  %v345_v48 = vfloor.f32 %v341_v43 }
 0x1b2   :  { %v350_v49 = vsub.f32 %v316_v28, %v346_v44  ;;  %v344_v51 = vfloor.f32 %v340_v45 }
 0x1b3   :  { %v739_v52 = vsub.f32 %v351_v46, %v355_v47  ;;  %v349_v53 = vmul.f32 6.2831855, %v345_v48  ;;  %v357_v60 = vmul.f32 -1.7484555e-07, %v345_v48 }
 0x1b4   :  { %v741_v54 = vsub.f32 %v350_v49, %v354_v50  ;;  %v348_v55 = vmul.f32 6.2831855, %v344_v51  ;;  %v356_v63 = vmul.f32 -1.7484555e-07, %v344_v51 }
 0x1b5   :  { %v363_v57 = vmul.f32 %v739_v52, %v739_v52  ;;  %v353_v58 = vsub.f32 %v331_v34, %v349_v53 }
 0x1b6   :  { %v362_v61 = vmul.f32 %v741_v54, %v741_v54  ;;  %v352_v62 = vsub.f32 %v326_v37, %v348_v55 }
 0x1b7   :  { %v747_v0 = vsub.f32 %v353_v58, %v357_v60  ;;  %v367_v2 = vmul.f32 -7.6471636e-13, %v363_v57 }
 0x1b8   :  { %v749_v3 = vsub.f32 %v352_v62, %v356_v63  ;;  %v366_v4 = vmul.f32 -7.6471636e-13, %v362_v61 }
 0x1b9   :  { %v365_v5 = vmul.f32 %v747_v0, %v747_v0  ;;  %v371_v7 = vadd.f32 1.6059044e-10, %v367_v2 }
 0x1ba   :  { %v364_v8 = vmul.f32 %v749_v3, %v749_v3  ;;  %v370_v9 = vadd.f32 1.6059044e-10, %v366_v4 }
 0x1bb   :  { %v375_v59 = vmul.f32 %v371_v7, %v363_v57  ;;  %v369_v10 = vmul.f32 -7.6471636e-13, %v365_v5 }
 0x1bc   :  { %v374_v11 = vmul.f32 %v370_v9, %v362_v61  ;;  %v368_v6 = vmul.f32 -7.6471636e-13, %v364_v8 }
 0x1bd   :  { %v379_v12 = vadd.f32 -2.5052108e-08, %v375_v59  ;;  %v373_v13 = vadd.f32 1.6059044e-10, %v369_v10 }
 0x1be   :  { %v378_v15 = vadd.f32 -2.5052108e-08, %v374_v11  ;;  %v372_v16 = vadd.f32 1.6059044e-10, %v368_v6 }
 0x1bf   :  { %v383_v17 = vmul.f32 %v379_v12, %v363_v57  ;;  %v377_v19 = vmul.f32 %v373_v13, %v365_v5 }
 0x1c0   :  { %v382_v1 = vmul.f32 %v378_v15, %v362_v61  ;;  %v376_v56 = vmul.f32 %v372_v16, %v364_v8 }
 0x1c1   :  { %v387_v20 = vadd.f32 2.7557319e-06, %v383_v17  ;;  %v381_v14 = vadd.f32 -2.5052108e-08, %v377_v19 }
 0x1c2   :  { %v386_v21 = vadd.f32 2.7557319e-06, %v382_v1  ;;  %v380_v22 = vadd.f32 -2.5052108e-08, %v376_v56 }
 0x1c3   :  { %v391_v23 = vmul.f32 %v387_v20, %v363_v57  ;;  %v385_v24 = vmul.f32 %v381_v14, %v365_v5 }
 0x1c4   :  { %v390_v25 = vmul.f32 %v386_v21, %v362_v61  ;;  %v384_v26 = vmul.f32 %v380_v22, %v364_v8 }
 0x1c5   :  { %v395_v27 = vadd.f32 -0.0001984127, %v391_v23  ;;  %v389_v28 = vadd.f32 2.7557319e-06, %v385_v24 }
 0x1c6   :  { %v394_v29 = vadd.f32 -0.0001984127, %v390_v25  ;;  %v388_v30 = vadd.f32 2.7557319e-06, %v384_v26 }
 0x1c7   :  { %v399_v31 = vmul.f32 %v395_v27, %v363_v57  ;;  %v393_v32 = vmul.f32 %v389_v28, %v365_v5 }
 0x1c8   :  { %v398_v33 = vmul.f32 %v394_v29, %v362_v61  ;;  %v392_v34 = vmul.f32 %v388_v30, %v364_v8 }
 0x1c9   :  { %v403_v35 = vadd.f32 0.008333334, %v399_v31  ;;  %v397_v36 = vadd.f32 -0.0001984127, %v393_v32 }
 0x1ca   :  { %v402_v37 = vadd.f32 0.008333334, %v398_v33  ;;  %v396_v38 = vadd.f32 -0.0001984127, %v392_v34 }
 0x1cb   :  { %v407_v39 = vmul.f32 %v403_v35, %v363_v57  ;;  %v401_v40 = vmul.f32 %v397_v36, %v365_v5 }
 0x1cc   :  { %v406_v41 = vmul.f32 %v402_v37, %v362_v61  ;;  %v400_v42 = vmul.f32 %v396_v38, %v364_v8 }
 0x1cd   :  { %v411_v43 = vadd.f32 -0.16666667, %v407_v39  ;;  %v405_v44 = vadd.f32 0.008333334, %v401_v40 }
 0x1ce   :  { %v410_v45 = vadd.f32 -0.16666667, %v406_v41  ;;  %v404_v46 = vadd.f32 0.008333334, %v400_v42 }
 0x1cf   :  { %v415_v47 = vmul.f32 %v411_v43, %v363_v57  ;;  %v409_v48 = vmul.f32 %v405_v44, %v365_v5 }
 0x1d0   :  { %v414_v49 = vmul.f32 %v410_v45, %v362_v61  ;;  %v408_v50 = vmul.f32 %v404_v46, %v364_v8 }
 0x1d1   :  { %v419_v51 = vmul.f32 %v415_v47, %v739_v52  ;;  %v413_v53 = vadd.f32 -0.16666667, %v409_v48 }
 0x1d2   :  { %v418_v55 = vmul.f32 %v414_v49, %v741_v54  ;;  %v412_v58 = vadd.f32 -0.16666667, %v408_v50 }
 0x1d3   :  { %v423_v60 = vadd.f32 %v419_v51, %v739_v52  ;;  %v417_v62 = vmul.f32 %v413_v53, %v365_v5  ;;  %v426_v52 = vld [vmem:[%s785_s5] sm:$0x3] }
 0x1d4   :  { %v422_v63 = vadd.f32 %v418_v55, %v741_v54  ;;  %v416_v2 = vmul.f32 %v412_v58, %v364_v8  ;;  %v431_v54 = vpop.permute.xlu0 %430 }
 0x1d5   :  { %v421_v4 = vmul.f32 %v417_v62, %v747_v0 }
 0x1d6   :  { %v573_v7 = vpack.c.bf16 %v423_v60, %v422_v63  ;;  %v420_v57 = vmul.f32 %v416_v2, %v749_v3 }
 0x1d7   :  { %v425_v61 = vadd.f32 %v421_v4, %v747_v0 }
 0x1d8   :  { %574 = vmatpush3.bf16.msra.mxu1 %v573_v7  ;;  %v424_v9 = vadd.f32 %v420_v57, %v749_v3 }
 0x1d9   :  { %575 = vmatprep.subr.bf16.mxu1 %v618_v18 }
 0x1da   :  { %v576_v59 = vpack.c.bf16 %v425_v61, %v424_v9 }
 0x1dc   :  { %577 = vmatpush3.bf16.msra.mxu1 %v576_v59 }
 0x1df   :  { %562 = vmatmul.mubr.msk.f32.vlgmr.msra.gmra.mrb[0].mxu1 %vm236_vm0, %v426_v52 }
 0x2b2   :  { %v502_v5 = vpop.f32.mrb[0].mxu1 }
 0x2b3   :  { %v503_v8 = vadd.f32 %v502_v5, %v431_v54  ;;  %v563_v10 = vpop.f32.mrb[1].mxu1 }
 0x2b5   :  { %506 = vst [vmem:[#allocation2] sm:$0x3] %v503_v8 }
 0x2b6   :  { %603 = shalt.err (!%p600_p4)
}
 0x2b7   :  { %s604_s5 = scalar_lea.hbm %s787_s7, 32 }
 0x2b8   :  { %p605_p5 = scmp.ne.s32.totalorder %s787_s7, %s604_s5  ;;  %p608_p6 = scmp.lt.u32.totalorder %s604_s5, %s787_s7 }
 0x2ba   :  { %p610_p7 = pnand %p608_p6, %p605_p5 }
 0x2bc   :  { %613 = shalt.err (!%p610_p7)
}
 0x2bd   :  { %516 = dma.vmem_to_hbm [thread:$0]  %s514_s11, 32, %s787_s7, [#allocation3]  }
 0x2be   :  { %614 = dma.done.wait [#allocation3], 32  }
 0x2bf   :  { %615 = vsyncadd [#allocation3], 4294967264 }
 0x2c0   :  { %520 = vsyncpa [#allocation3], 1 }

</bundles_post_ra>
